<compile_context>
chip_gen: v6e
topology: v6e:2x2x1
jax: 0.10.0
libtpu: 0.0.40
codegen_flags: <defaults>
</compile_context>

<pallas_src>
import math

import jax
import jax.numpy as jnp
from jax.experimental import pallas as pl
from jax.experimental.pallas import tpu as pltpu


def make_pe(time_len: int, dim: int) -> jnp.ndarray:
    """Build the buffer exactly as the PyTorch __init__ does (float32)."""
    t = jnp.arange(0, time_len, 1, dtype=jnp.float32)
    time_div_term = jnp.exp(t * (-math.log(10000.0) / time_len))      # (time_len,)
    pe = jnp.zeros((time_len, dim), jnp.float32) + jnp.sin(time_div_term)[:, None]
    return pe[None]                                                   # (1, time_len, dim)


def _add_pe_kernel(x_ref, pe_ref, o_ref):
    # x_ref / o_ref: (ROW_TILE, LANE_TILE)  — lane-dense tile of the [B, N*D] view.
    # pe_ref:        (1, LANE_TILE) float32 — broadcast over the sublane (row) axis.
    o_ref[...] = x_ref[...] + pe_ref[...].astype(x_ref.dtype)


def _pick_tile(full: int, unit: int, target: int) -> int:
    """Largest tile <= target that is a multiple of `unit` and divides `full`.

    Falls back to the full dimension, which is always a legal block size.
    """
    if full <= target or full % unit != 0:
        return full
    t = (target // unit) * unit
    while t >= unit:
        if full % t == 0:
            return t
        t -= unit
    return full


def temporal_positional_encoding(x: jnp.ndarray, pe: jnp.ndarray,
                                 *, donate_x: bool = False) -> jnp.ndarray:
    """x: [B, N, D]; pe: [1, time_len, D] buffer with time_len >= N."""
    B, N, D = x.shape
    C = N * D

    # pe[t, d] is constant over d, and the row-major flattened [N*D] pattern is
    # identical for every batch row -> a single tiny (1, N*D) stream suffices.
    pe_row = jnp.reshape(pe[:, :N, :], (1, C))            # (1, C) float32, tiny

    # Lane-dense 2-D view: rows = batch, lanes = N*D (multiple of 128 in practice).
    x2 = jnp.reshape(x, (B, C))

    # Tile choices: sublane tile multiple of 8 (or full B), lane tile multiple
    # of 128 (or full C). Per-buffer tile <= 512*2048*4B = 4 MiB; with
    # double-buffered in/out (+ tiny pe) this stays within every generation's
    # scoped-VMEM budget.
    row_tile = _pick_tile(B, 8, 512)
    lane_tile = _pick_tile(C, 128, 2048)
    grid = (B // row_tile, C // lane_tile)

    out2 = pl.pallas_call(
        _add_pe_kernel,
        out_shape=jax.ShapeDtypeStruct((B, C), x.dtype),
        grid_spec=pltpu.PrefetchScalarGridSpec(
            num_scalar_prefetch=0,
            grid=grid,
            in_specs=[
                pl.BlockSpec((row_tile, lane_tile), lambda b, c: (b, c)),
                pl.BlockSpec((1, lane_tile), lambda b, c: (0, c)),
            ],
            out_specs=pl.BlockSpec((row_tile, lane_tile), lambda b, c: (b, c)),
        ),
        compiler_params=pltpu.CompilerParams(
            dimension_semantics=("parallel", "parallel"),
            vmem_limit_bytes=32 * 1024 * 1024,
        ),
        input_output_aliases=({0: 0} if donate_x else {}),
    )(x2, pe_row)

    return jnp.reshape(out2, (B, N, D))


if __name__ == "__main__":
    # Small shapes consistent with the forward: x is [B, N, D].
    B, N, D = 2, 8, 32
    time_len = 128  # module-style max sequence length (>= N)

    key = jax.random.PRNGKey(0)
    x = jax.random.normal(key, (B, N, D), dtype=jnp.float32)
    pe = make_pe(time_len, D)

    fwd = jax.jit(temporal_positional_encoding)
    out = jax.block_until_ready(fwd(x, pe))

    # Reference check in plain JAX.
    ref = x + pe[:, :N, :].astype(x.dtype)
    assert out.shape == (B, N, D)
    assert jnp.allclose(out, ref, atol=1e-6, rtol=1e-6)

    print("KERNEL_OK")
</pallas_src>

<mosaic_0001>
module attributes {stable_mosaic.version = 11 : i64} {
  func.func @_add_pe_kernel(%arg0: i32, %arg1: i32, %arg2: memref<2x256xf32, #tpu.memory_space<vmem>>, %arg3: memref<1x256xf32, #tpu.memory_space<vmem>>, %arg4: memref<2x256xf32, #tpu.memory_space<vmem>>) attributes {dimension_semantics = [#tpu.dimension_semantics<parallel>, #tpu.dimension_semantics<parallel>], iteration_bounds = array<i64: 1, 1>, scalar_prefetch = 0 : i64, scratch_operands = 0 : i64, tpu.core_type = #tpu.core_type<tc>, window_params = [{transform_indices = @transform_0, window_bounds = array<i64: 2, 256>}, {transform_indices = @transform_1, window_bounds = array<i64: 1, 256>}, {transform_indices = @transform_2, window_bounds = array<i64: 2, 256>}]} {
    %c0 = arith.constant 0 : index
    %c0_0 = arith.constant 0 : index
    %0 = vector.load %arg2[%c0, %c0_0] : memref<2x256xf32, #tpu.memory_space<vmem>>, vector<2x256xf32>
    %c0_1 = arith.constant 0 : index
    %c0_2 = arith.constant 0 : index
    %1 = vector.load %arg3[%c0_1, %c0_2] : memref<1x256xf32, #tpu.memory_space<vmem>>, vector<1x256xf32>
    %2 = vector.broadcast %1 : vector<1x256xf32> to vector<2x256xf32>
    %3 = arith.addf %0, %2 : vector<2x256xf32>
    %c0_3 = arith.constant 0 : index
    %c0_4 = arith.constant 0 : index
    %4 = vector.load %arg4[%c0_3, %c0_4] : memref<2x256xf32, #tpu.memory_space<vmem>>, vector<2x256xf32>
    tpu.vector_store %arg4[%c0_3, %c0_4], %3 {strides = array<i32>} : memref<2x256xf32, #tpu.memory_space<vmem>>, vector<2x256xf32>,
    return
  }
  func.func @transform_0(%arg0: i32, %arg1: i32) -> (i32, i32) {
    %c0_i32 = arith.constant 0 : i32
    return %arg0, %arg1 : i32, i32
  }
  func.func @transform_1(%arg0: i32, %arg1: i32) -> (i32, i32) {
    %c0_i32 = arith.constant 0 : i32
    %c0_i32_0 = arith.constant 0 : i32
    return %c0_i32, %arg1 : i32, i32
  }
  func.func @transform_2(%arg0: i32, %arg1: i32) -> (i32, i32) {
    %c0_i32 = arith.constant 0 : i32
    return %arg0, %arg1 : i32, i32
  }
}

</mosaic_0001>

<bundles_post_ra>
// kernel: temporal_positional_encoding.1
= control target key start
LH: loop header
LB: loop body
LE: loop exit
PB: predicated region body
PF: predicated region fallthrough
CT: control target
= control target key end

     0   :  { %v14_v0 = vlaneseq  ;;  %v38_v1 = vmov 1983009808   ;;  %s63_s1 = inlined_call_operand.vmem [shape: f32[1,256], index: 1, kind: input, shape index: {}]   ;;  %s64_s0 = inlined_call_operand.vmem [shape: f32[2,256], index: 0, kind: input, shape index: {}]   ;;  %s65_s2 = inlined_call_operand.vmem [shape: f32[2,256], index: 2, kind: output, shape index: {}]  }
   0x1   :  { %v24_v2 = vunpack.c.l.s4 %v38_v1  ;;  %v12_v4 = vld [vmem:[%s63_s1] sm:$0x3] }
   0x2   :  { %v15_v3 = vshrl.u32 %v14_v0, 7  ;;  %v11_v12 = vld [vmem:[%s64_s0] sm:$0xf] }
   0x3   :  { %v25_v5 = vunpack.c.0.s8 %v24_v2 }
   0x4   :  { %v16_v6 = vsub.s32 0, %v15_v3  ;;  %v20_v7 = vsub.s32 1, %v15_v3 }
   0x5   :  { %v28_v10 = vsub.s32 %v25_v5, %v15_v3 }
   0x6   :  { %v17_v8 = vrot.slane %v12_v4, %v16_v6  ;;  %v21_v9 = vrot.slane %v12_v4, %v20_v7 }
   0x8   :  { %v22_v11 = vcombine.low %v17_v8, %v21_v9 }
   0xa   :  { %v29_v13 = vrot.slane %v22_v11, %v28_v10 }
   0xc   :  { %v31_v14 = vadd.f32 %v29_v13, %v11_v12 }
   0xe   :  { %32 = vst [vmem:[%s65_s2] sm:$0xf] %v31_v14 }

</bundles_post_ra>
